<compile_context>
chip_gen: v7x
topology: tpu7x:2x2x1
jax: 0.10.0
libtpu: 0.0.40
codegen_flags: <defaults>
</compile_context>

<pallas_src>
import functools
import math

import numpy as np

import jax
import jax.numpy as jnp
from jax.experimental import pallas as pl
from jax.experimental.pallas import tpu as pltpu


def _round_up(n, m):
    return ((n + m - 1) // m) * m


def _vmem_limit_bytes():
    # ~75% of physical VMEM (leave double-buffer headroom), capped at 96 MiB.
    # Fallback of 48 MiB is safe on every generation including v7x (64 MiB).
    try:
        phys = pltpu.get_tpu_info().vmem_capacity_bytes
        return int(min((phys * 3) // 4, 96 * 1024 * 1024))
    except Exception:
        return 48 * 1024 * 1024


VMEM_LIMIT_BYTES = _vmem_limit_bytes()


def _tile_and_pad(dim, pref, align):
    """Pick a tile for `dim`.

    Small dims (<= pref) use one full-dim block (always legal, no padding).
    Large dims use an `align`-aligned `pref`-sized tile and the dim is padded up
    to a multiple of the tile -- no silent whole-dimension fallback."""
    if dim <= pref:
        return dim, dim
    tile = _round_up(pref, align)
    return tile, _round_up(dim, tile)


def _ln_math(x, g, b, eps, out_dtype):
    mu = jnp.mean(x, axis=-1, keepdims=True)
    xc = x - mu
    var = jnp.mean(xc * xc, axis=-1, keepdims=True)
    y = xc * jax.lax.rsqrt(var + eps)
    return (y * g + b).astype(out_dtype)


def _activate(y, activation):
    if activation == "gelu":
        # TODO(synk): HF BERT default is erf-GELU; tanh approx kept for portable
        # Mosaic lowering (small systematic divergence from the PyTorch ref).
        c = math.sqrt(2.0 / math.pi)
        return 0.5 * y * (1.0 + jnp.tanh(c * (y + 0.044715 * y * y * y)))
    if activation == "tanh":
        return jnp.tanh(y)
    return y


# ----------------------------- dense (matmul) ------------------------------ #
# Full-K block (no reduction grid axis), f32 accumulation on the MXU, f32
# epilogue; optional fused residual-add + LayerNorm epilogue (tn == N).

def _dense_kernel(x_ref, w_ref, b_ref, o_ref, *, activation):
    y = jnp.dot(x_ref[...], w_ref[...], preferred_element_type=jnp.float32)
    y = y + b_ref[...].astype(jnp.float32)
    o_ref[...] = _activate(y, activation).astype(o_ref.dtype)


def _dense_res_ln_kernel(x_ref, w_ref, b_ref, r_ref, g_ref, bb_ref, o_ref, *, eps):
    y = jnp.dot(x_ref[...], w_ref[...], preferred_element_type=jnp.float32)
    y = y + b_ref[...].astype(jnp.float32) + r_ref[...].astype(jnp.float32)
    o_ref[...] = _ln_math(y, g_ref[...].astype(jnp.float32),
                          bb_ref[...].astype(jnp.float32), eps, o_ref.dtype)


def dense(x, w, b, *, activation="none", residual=None, ln=None, eps=1e-12,
          out_dtype=None, tm=256, tn=512):
    """y = act(x @ w + b)  or  LayerNorm(x @ w + b + residual) when ln is given.

    x:(M,K), w:(K,N) [bf16 recommended], b:(N,).  Full-K blocks; grid (M/tm,N/tn).
    TODO(synk): on v7x, fp8 weight quantization for FFN/QKV GEMMs (keep bf16
    activations, f32 accum) would halve weight HBM/VMEM traffic."""
    M, K = x.shape
    Kw, N = w.shape
    assert K == Kw
    out_dtype = out_dtype or x.dtype
    fuse_ln = ln is not None
    if fuse_ln:
        assert residual is not None

    m_align = 16 if x.dtype == jnp.bfloat16 else 8   # bf16 sublane packing
    tm, Mp = _tile_and_pad(M, tm, m_align)
    if fuse_ln:
        tn, Np = N, N            # LN needs the full feature row in one block
    else:
        # 128-aligned tiles are enough on v5e; pref 512 is already 256-aligned
        # which fills the v6e/v7x 2x256 MXU.
        tn, Np = _tile_and_pad(N, tn, 128)

    if Mp != M:
        x = jnp.pad(x, ((0, Mp - M), (0, 0)))
        if residual is not None:
            residual = jnp.pad(residual, ((0, Mp - M), (0, 0)))
    if Np != N:
        w = jnp.pad(w, ((0, 0), (0, Np - N)))
        b = jnp.pad(b, (0, Np - N))

    grid = (Mp // tm, Np // tn)
    x_spec = pl.BlockSpec((tm, K), lambda i, j: (i, 0))
    w_spec = pl.BlockSpec((K, tn), lambda i, j: (0, j))
    b_spec = pl.BlockSpec((1, tn), lambda i, j: (0, j))
    o_spec = pl.BlockSpec((tm, tn), lambda i, j: (i, j))

    res_bytes = (residual.dtype.itemsize * Mp * N) if residual is not None else 0
    cost = pl.CostEstimate(
        flops=2 * Mp * Np * K,
        transcendentals=(Mp * Np if (activation in ("gelu", "tanh") or fuse_ln) else 0),
        bytes_accessed=(x.dtype.itemsize * Mp * K + w.dtype.itemsize * K * Np
                        + 4 * Np + np.dtype(out_dtype).itemsize * Mp * Np + res_bytes),
    )
    cp = pltpu.CompilerParams(dimension_semantics=("parallel", "parallel"),
                              vmem_limit_bytes=VMEM_LIMIT_BYTES)

    if fuse_ln:
        g, bb = ln
        out = pl.pallas_call(
            functools.partial(_dense_res_ln_kernel, eps=eps),
            out_shape=jax.ShapeDtypeStruct((Mp, Np), out_dtype),
            grid=grid,
            in_specs=[x_spec, w_spec, b_spec,
                      pl.BlockSpec((tm, N), lambda i, j: (i, 0)),
                      pl.BlockSpec((1, N), lambda i, j: (0, 0)),
                      pl.BlockSpec((1, N), lambda i, j: (0, 0))],
            out_specs=o_spec,
            compiler_params=cp,
            cost_estimate=cost,
        )(x, w, b.reshape(1, Np), residual, g.reshape(1, N), bb.reshape(1, N))
    else:
        out = pl.pallas_call(
            functools.partial(_dense_kernel, activation=activation),
            out_shape=jax.ShapeDtypeStruct((Mp, Np), out_dtype),
            grid=grid,
            in_specs=[x_spec, w_spec, b_spec],
            out_specs=o_spec,
            compiler_params=cp,
            cost_estimate=cost,
        )(x, w, b.reshape(1, Np))

    if Mp != M or Np != N:
        out = out[:M, :N]
    return out


# ------------------------------- layernorm --------------------------------- #
# Standalone LN only used for the embedding layernorm (the per-layer LNs are
# fused into the preceding dense epilogue).

def _layernorm_kernel(x_ref, g_ref, b_ref, o_ref, *, eps):
    o_ref[...] = _ln_math(x_ref[...].astype(jnp.float32),
                          g_ref[...].astype(jnp.float32),
                          b_ref[...].astype(jnp.float32), eps, o_ref.dtype)


def layernorm(x, g, b, *, eps=1e-12, out_dtype=None, tm=256):
    M, H = x.shape
    out_dtype = out_dtype or x.dtype
    align = 16 if x.dtype == jnp.bfloat16 else 8
    tm, Mp = _tile_and_pad(M, tm, align)
    xp = jnp.pad(x, ((0, Mp - M), (0, 0))) if Mp != M else x
    out = pl.pallas_call(
        functools.partial(_layernorm_kernel, eps=eps),
        out_shape=jax.ShapeDtypeStruct((Mp, H), out_dtype),
        grid=(Mp // tm,),
        in_specs=[pl.BlockSpec((tm, H), lambda i: (i, 0)),
                  pl.BlockSpec((1, H), lambda i: (0, 0)),
                  pl.BlockSpec((1, H), lambda i: (0, 0))],
        out_specs=pl.BlockSpec((tm, H), lambda i: (i, 0)),
        compiler_params=pltpu.CompilerParams(
            dimension_semantics=("parallel",),
            vmem_limit_bytes=VMEM_LIMIT_BYTES),
    )(xp, g.reshape(1, H), b.reshape(1, H))
    return out if Mp == M else out[:M]


# -------------------------------- attention -------------------------------- #
# Consumes the fused QKV dense output directly (B, S, 3H); per grid step one
# batch element, all heads; heads are packed back along lanes so the output is
# stored lane-dense in (tokens, hidden) layout (no transpose glue either side).

def _attn_kernel(qkv_ref, m_ref, o_ref, *, nh, hd, scale):
    H = nh * hd
    qkv = qkv_ref[0]                           # (S, 3H)  bf16
    m = m_ref[0].astype(jnp.float32)           # (1, S)   additive mask
    ctx = []
    # TODO(synk): for long S (>= ~512) switch to a tq x tk flash/online-softmax
    # loop (grid (B, S/tq)) so the per-head (S,S) score tile never pressures
    # v7x's 64 MiB VMEM and both v7x TensorCores stay busy at small B.
    for h in range(nh):
        q = qkv[:, h * hd:(h + 1) * hd]
        k = qkv[:, H + h * hd:H + (h + 1) * hd]
        v = qkv[:, 2 * H + h * hd:2 * H + (h + 1) * hd]
        # contract on the last dims of q/k -> no XLU transpose of k
        s = jnp.einsum("qd,kd->qk", q, k,
                       preferred_element_type=jnp.float32) * scale + m
        s = s - jnp.max(s, axis=-1, keepdims=True)
        p = jnp.exp(s)
        p = p * pl.reciprocal(jnp.sum(p, axis=-1, keepdims=True), approx=True)
        ctx.append(jnp.dot(p.astype(v.dtype), v,
                           preferred_element_type=jnp.float32))
    o_ref[0] = jnp.concatenate(ctx, axis=-1).astype(o_ref.dtype)


def attention(qkv, mask, *, nh, hd, seq):
    """qkv: (B*S, 3H) packed as (3, nh, hd) along lanes; mask: (B,1,S) additive.
    Returns (B*S, H) already in token-major, lane-dense layout."""
    BS, threeH = qkv.shape
    H = nh * hd
    assert threeH == 3 * H
    B = BS // seq
    qkv3 = qkv.reshape(B, seq, 3 * H)          # no-copy reshape
    cost = pl.CostEstimate(
        flops=4 * B * nh * seq * seq * hd,
        transcendentals=B * nh * seq * seq,
        bytes_accessed=qkv.dtype.itemsize * 4 * B * seq * H + 4 * B * seq,
    )
    out = pl.pallas_call(
        functools.partial(_attn_kernel, nh=nh, hd=hd, scale=1.0 / math.sqrt(hd)),
        out_shape=jax.ShapeDtypeStruct((B, seq, H), qkv.dtype),
        grid=(B,),
        in_specs=[pl.BlockSpec((1, seq, 3 * H), lambda b: (b, 0, 0)),
                  pl.BlockSpec((1, 1, seq), lambda b: (b, 0, 0))],
        out_specs=pl.BlockSpec((1, seq, H), lambda b: (b, 0, 0)),
        compiler_params=pltpu.CompilerParams(
            dimension_semantics=("parallel",),
            vmem_limit_bytes=VMEM_LIMIT_BYTES),
        cost_estimate=cost,
    )(qkv3, mask)
    return out.reshape(BS, H)


# --------------------------- pooler + classifier --------------------------- #
# Fused: pooled = tanh(cls @ Wp + bp); logits = pooled @ Wfc + bfc.  One kernel,
# fc weight pre-padded to 128 lanes at init time (lane-dense store).

def _head_kernel(cls_ref, pw_ref, pb_ref, fw_ref, fb_ref, o_ref):
    pooled = jnp.tanh(
        jnp.dot(cls_ref[...], pw_ref[...], preferred_element_type=jnp.float32)
        + pb_ref[...].astype(jnp.float32))
    # TODO(synk): nn.Dropout(0.3) on the pooled output is identity at inference;
    # training-mode dropout (PRNG mask) not implemented.
    logits = jnp.dot(pooled.astype(fw_ref.dtype), fw_ref[...],
                     preferred_element_type=jnp.float32) + fb_ref[...].astype(jnp.float32)
    o_ref[...] = logits.astype(o_ref.dtype)


def classifier_head(cls, pool_w, pool_b, fc_w, fc_b):
    B, H = cls.shape
    Np = fc_w.shape[1]
    return pl.pallas_call(
        _head_kernel,
        out_shape=jax.ShapeDtypeStruct((B, Np), jnp.float32),
        grid=(1,),
        in_specs=[pl.BlockSpec((B, H), lambda i: (0, 0)),
                  pl.BlockSpec((H, H), lambda i: (0, 0)),
                  pl.BlockSpec((1, H), lambda i: (0, 0)),
                  pl.BlockSpec((H, Np), lambda i: (0, 0)),
                  pl.BlockSpec((1, Np), lambda i: (0, 0))],
        out_specs=pl.BlockSpec((B, Np), lambda i: (0, 0)),
        compiler_params=pltpu.CompilerParams(
            dimension_semantics=("arbitrary",),
            vmem_limit_bytes=VMEM_LIMIT_BYTES),
    )(cls, pool_w, pool_b.reshape(1, H), fc_w, fc_b.reshape(1, Np))


# ------------------------------ Model (glue) ------------------------------- #

CFG = dict(vocab=100, hidden=32, heads=4, head_dim=8, inter=64,
           max_pos=16, type_vocab=2, layers=2, num_classes=1)


def init_params(key, cfg):
    def nrm(k, shape, scale=0.02):
        return scale * jax.random.normal(k, shape, dtype=jnp.float32)

    H, I, NC = cfg["hidden"], cfg["inter"], cfg["num_classes"]
    n_pad = _round_up(NC, 128)             # fc padding hoisted out of forward
    keys = iter(jax.random.split(key, 64))
    params = dict(
        word_emb=nrm(next(keys), (cfg["vocab"], H)),
        pos_emb=nrm(next(keys), (cfg["max_pos"], H)),
        type_emb=nrm(next(keys), (cfg["type_vocab"], H)),
        emb_ln_g=jnp.ones((H,), jnp.float32),
        emb_ln_b=jnp.zeros((H,), jnp.float32),
        pool_w=nrm(next(keys), (H, H)).astype(jnp.bfloat16),
        pool_b=jnp.zeros((H,), jnp.float32),
        fc_w=jnp.pad(nrm(next(keys), (H, NC)),
                     ((0, 0), (0, n_pad - NC))).astype(jnp.bfloat16),
        fc_b=jnp.zeros((n_pad,), jnp.float32),
        layers=[],
    )
    for _ in range(cfg["layers"]):
        params["layers"].append(dict(
            # fused Q|K|V projection -> one matmul per layer instead of three
            w_qkv=nrm(next(keys), (H, 3 * H)).astype(jnp.bfloat16),
            b_qkv=jnp.zeros((3 * H,), jnp.float32),
            wo=nrm(next(keys), (H, H)).astype(jnp.bfloat16),
            bo=jnp.zeros((H,), jnp.float32),
            ln1_g=jnp.ones((H,), jnp.float32), ln1_b=jnp.zeros((H,), jnp.float32),
            w_in=nrm(next(keys), (H, I)).astype(jnp.bfloat16),
            b_in=jnp.zeros((I,), jnp.float32),
            w_out=nrm(next(keys), (I, H)).astype(jnp.bfloat16),
            b_out=jnp.zeros((H,), jnp.float32),
            ln2_g=jnp.ones((H,), jnp.float32), ln2_b=jnp.zeros((H,), jnp.float32),
        ))
    return params


def bert_classifier_forward(params, input_ids, attention_mask, cfg):
    B, S = input_ids.shape
    H, nh, hd = cfg["hidden"], cfg["heads"], cfg["head_dim"]
    NC = cfg["num_classes"]

    # embeddings (gather = glue), layernorm kernel emits bf16 activations
    # TODO(synk): token_type_ids assumed all-zero (matches the PyTorch call).
    emb = (params["word_emb"][input_ids]
           + params["pos_emb"][:S][None, :, :]
           + params["type_emb"][0][None, None, :])
    x = layernorm(emb.reshape(B * S, H), params["emb_ln_g"], params["emb_ln_b"],
                  out_dtype=jnp.bfloat16)

    # additive attention mask, shape (B,1,S); stays f32 so masked keys never leak
    ext_mask = ((1.0 - attention_mask.astype(jnp.float32)) * -10000.0).reshape(B, 1, S)

    for layer in params["layers"]:
        # fused QKV projection: one pallas_call, one HBM read of x
        qkv = dense(x, layer["w_qkv"], layer["b_qkv"])                   # (B*S, 3H)
        # attention reads qkv directly (no reshape/transpose HBM round trip)
        ctx = attention(qkv, ext_mask, nh=nh, hd=hd, seq=S)              # (B*S, H)
        # attention-output projection with fused residual-add + LayerNorm
        x = dense(ctx, layer["wo"], layer["bo"],
                  residual=x, ln=(layer["ln1_g"], layer["ln1_b"]))
        # FFN
        h = dense(x, layer["w_in"], layer["b_in"], activation="gelu")
        x = dense(h, layer["w_out"], layer["b_out"],
                  residual=x, ln=(layer["ln2_g"], layer["ln2_b"]))

    # pooler + dropout(identity) + classifier, fused into one kernel
    cls = x.reshape(B, S, H)[:, 0, :]
    logits = classifier_head(cls, params["pool_w"], params["pool_b"],
                             params["fc_w"], params["fc_b"])[:, :NC]
    return logits.astype(jnp.float32)


# ---------------------------------- main ----------------------------------- #

if __name__ == "__main__":
    key = jax.random.PRNGKey(0)
    k_param, k_ids = jax.random.split(key)

    B, S = 2, 8
    params = init_params(k_param, CFG)
    input_ids = jax.random.randint(k_ids, (B, S), 0, CFG["vocab"], dtype=jnp.int32)
    attention_mask = jnp.ones((B, S), dtype=jnp.int32).at[1, 6:].set(0)

    logits = bert_classifier_forward(params, input_ids, attention_mask, CFG)
    jax.block_until_ready(logits)
    assert logits.shape == (B, CFG["num_classes"])
    print("KERNEL_OK")
</pallas_src>

<mosaic_0001>
module attributes {stable_mosaic.version = 11 : i64} {
  func.func @_layernorm_kernel(%arg0: i32, %arg1: memref<16x32xf32, #tpu.memory_space<vmem>>, %arg2: memref<1x32xf32, #tpu.memory_space<vmem>>, %arg3: memref<1x32xf32, #tpu.memory_space<vmem>>, %arg4: memref<16x32xbf16, #tpu.memory_space<vmem>>) attributes {dimension_semantics = [#tpu.dimension_semantics<parallel>], iteration_bounds = array<i64: 1>, scalar_prefetch = 0 : i64, scratch_operands = 0 : i64, tpu.core_type = #tpu.core_type<tc>, window_params = [{transform_indices = @transform_0, window_bounds = array<i64: 16, 32>}, {pipeline_mode = #tpu.pipeline_mode<synchronous>, transform_indices = @transform_1, window_bounds = array<i64: 1, 32>}, {pipeline_mode = #tpu.pipeline_mode<synchronous>, transform_indices = @transform_2, window_bounds = array<i64: 1, 32>}, {transform_indices = @transform_3, window_bounds = array<i64: 16, 32>}]} {
    %c0 = arith.constant 0 : index
    %c0_0 = arith.constant 0 : index
    %0 = vector.load %arg1[%c0, %c0_0] : memref<16x32xf32, #tpu.memory_space<vmem>>, vector<16x32xf32>
    %c0_1 = arith.constant 0 : index
    %c0_2 = arith.constant 0 : index
    %1 = vector.load %arg2[%c0_1, %c0_2] : memref<1x32xf32, #tpu.memory_space<vmem>>, vector<1x32xf32>
    %c0_3 = arith.constant 0 : index
    %c0_4 = arith.constant 0 : index
    %2 = vector.load %arg3[%c0_3, %c0_4] : memref<1x32xf32, #tpu.memory_space<vmem>>, vector<1x32xf32>
    %cst = arith.constant dense<0.000000e+00> : vector<16xf32>
    %3 = vector.multi_reduction <add>, %0, %cst [1] : vector<16x32xf32> to vector<16xf32>
    %4 = vector.shape_cast %3 : vector<16xf32> to vector<16x1xf32>
    %cst_5 = arith.constant 3.200000e+01 : f32
    %5 = vector.broadcast %cst_5 : f32 to vector<16x1xf32>
    %6 = arith.divf %4, %5 : vector<16x1xf32>
    %7 = vector.broadcast %6 : vector<16x1xf32> to vector<16x32xf32>
    %8 = arith.subf %0, %7 : vector<16x32xf32>
    %9 = arith.mulf %8, %8 : vector<16x32xf32>
    %cst_6 = arith.constant dense<0.000000e+00> : vector<16xf32>
    %10 = vector.multi_reduction <add>, %9, %cst_6 [1] : vector<16x32xf32> to vector<16xf32>
    %11 = vector.shape_cast %10 : vector<16xf32> to vector<16x1xf32>
    %cst_7 = arith.constant 3.200000e+01 : f32
    %12 = vector.broadcast %cst_7 : f32 to vector<16x1xf32>
    %13 = arith.divf %11, %12 : vector<16x1xf32>
    %cst_8 = arith.constant 9.99999996E-13 : f32
    %14 = vector.broadcast %cst_8 : f32 to vector<16x1xf32>
    %15 = arith.addf %13, %14 : vector<16x1xf32>
    %16 = math.rsqrt %15 : vector<16x1xf32>
    %17 = vector.broadcast %16 : vector<16x1xf32> to vector<16x32xf32>
    %18 = arith.mulf %8, %17 : vector<16x32xf32>
    %19 = vector.broadcast %1 : vector<1x32xf32> to vector<16x32xf32>
    %20 = arith.mulf %18, %19 : vector<16x32xf32>
    %21 = vector.broadcast %2 : vector<1x32xf32> to vector<16x32xf32>
    %22 = arith.addf %20, %21 : vector<16x32xf32>
    %23 = arith.truncf %22 : vector<16x32xf32> to vector<16x32xbf16>
    %c0_9 = arith.constant 0 : index
    %c0_10 = arith.constant 0 : index
    %24 = vector.load %arg4[%c0_9, %c0_10] : memref<16x32xbf16, #tpu.memory_space<vmem>>, vector<16x32xbf16>
    tpu.vector_store %arg4[%c0_9, %c0_10], %23 {strides = array<i32>} : memref<16x32xbf16, #tpu.memory_space<vmem>>, vector<16x32xbf16>,
    return
  }
  func.func @transform_0(%arg0: i32) -> (i32, i32) {
    %c0_i32 = arith.constant 0 : i32
    %c0_i32_0 = arith.constant 0 : i32
    return %arg0, %c0_i32 : i32, i32
  }
  func.func @transform_1(%arg0: i32) -> (i32, i32) {
    %c0_i32 = arith.constant 0 : i32
    %c0_i32_0 = arith.constant 0 : i32
    %c0_i32_1 = arith.constant 0 : i32
    return %c0_i32, %c0_i32_0 : i32, i32
  }
  func.func @transform_2(%arg0: i32) -> (i32, i32) {
    %c0_i32 = arith.constant 0 : i32
    %c0_i32_0 = arith.constant 0 : i32
    %c0_i32_1 = arith.constant 0 : i32
    return %c0_i32, %c0_i32_0 : i32, i32
  }
  func.func @transform_3(%arg0: i32) -> (i32, i32) {
    %c0_i32 = arith.constant 0 : i32
    %c0_i32_0 = arith.constant 0 : i32
    return %arg0, %c0_i32 : i32, i32
  }
}

</mosaic_0001>

<bundles_post_ra>
// kernel: tpu_custom_call.1
= control target key start
LH: loop header
LB: loop body
LE: loop exit
PB: predicated region body
PF: predicated region fallthrough
CT: control target
= control target key end

     0   :  { %8 = vsyncpa [#allocation3], 0  ;;  %s229_s0 = inlined_call_operand.hbm [shape: f32[16,32], index: 0, kind: input, shape index: {}]   ;;  %s230_s1 = inlined_call_operand.vmem [shape: f32[1,32], index: 1, kind: input, shape index: {}]   ;;  %s231_s2 = inlined_call_operand.vmem [shape: f32[1,32], index: 2, kind: input, shape index: {}]   ;;  %s232_s3 = inlined_call_operand.hbm [shape: bf16[16,32], index: 3, kind: output, shape index: {}]  }
   0x1   :  { %9 = vsyncpa [#allocation4], 0  ;;  %s169_s12 = smov [#allocation2]   ;;  %s121_s16 = scalar_lea.hbm %s229_s0, 256 }
   0x2   :  { %s15_s13 = sshll.u32 %s169_s12, 4  ;;  %p122_p0 = scmp.ne.s32.totalorder %s229_s0, %s121_s16  ;;  %s16_s13 = int_to_ptr.vmem [resolvable:$true] %s15_s13 }
   0x3   :  { %p125_p1 = scmp.lt.u32.totalorder %s121_s16, %s229_s0 }
   0x5   :  { %p127_p2 = pnand %p125_p1, %p122_p0 }
   0x7   :  { %130 = shalt.err (!%p127_p2)
}
   0x8   :  { %s131_s21 = scalar_lea.vmem %s16_s13, 256  ;;  %p136_p4 = scmp.lt.s32.totalorder %s16_s13, %s16_s13 }
   0x9   :  { %p132_p3 = scmp.ne.s32.totalorder %s16_s13, %s131_s21  ;;  %p137_p5 = scmp.lt.s32.totalorder %s131_s21, %s131_s21 }
   0xb   :  { %p138_p6 = por %p137_p5, %p136_p4 }
   0xd   :  { %p139_p7 = pnand %p138_p6, %p132_p3 }
   0xf   :  { %142 = shalt.err (!%p139_p7)
}
  0x10   :  { %s170_s22 = smov 128   ;;  %s171_s23 = smov 8  }
  0x11   :  { %21 = dma.hbm_to_vmem [thread:$0]  %s229_s0, 256, %s16_s13, [#allocation3], %s170_s22, %s170_s22, %s171_s23  }
  0x12   :  { %165 = dma.done.wait [#allocation3], 256  }
  0x13   :  { %166 = vsyncadd [#allocation3], 4294967040  ;;  %vm33_vm0 = vcmask 261120   ;;  %v29_v0 = vld [vmem:[#allocation2] sm:$0xff]  ;;  %v30_v1 = vld [vmem:[#allocation2 + $0x8] sm:$0xff]  ;;  %vm85_vm1 = vcmask 257024  }
  0x14   :  { %v34_v2 = vsel %vm33_vm0, %v29_v0, 0.0  ;;  %v37_v3 = vsel %vm33_vm0, %v30_v1, 0.0  ;;  %v105_v21 = vld [vmem:[%s230_s1] ss:$0 sm:$0xff]  ;;  %s172_s29 = smov [#allocation5]  }
  0x15   :  { %35 = vadd.xlane.f32.xlu0 %v34_v2  ;;  %v106_v23 = vld [vmem:[%s231_s2] ss:$0 sm:$0xff]  ;;  %s93_s30 = sshll.u32 %s172_s29, 4  ;;  %s94_s30 = int_to_ptr.vmem [resolvable:$true] %s93_s30 }
  0x16   :  { %s143_s1 = scalar_lea.vmem %s94_s30, 128  ;;  %p148_p9 = scmp.lt.s32.totalorder %s94_s30, %s94_s30 }
  0x17   :  { %p144_p8 = scmp.ne.s32.totalorder %s94_s30, %s143_s1  ;;  %p149_p10 = scmp.lt.s32.totalorder %s143_s1, %s143_s1 }
  0x19   :  { %38 = vadd.xlane.f32.xlu0 %v37_v3  ;;  %p150_p11 = por %p149_p10, %p148_p9 }
  0x1b   :  { %p151_p12 = pnand %p150_p11, %p144_p8 }
  0xa2   :  { %v36_v4 = vpop.xlane.xlu0 %35 }
  0xa3   :  { %v41_v5 = vmul.f32 0.03125, %v36_v4 }
  0xa5   :  { %v43_v6 = vsub.f32 %v29_v0, %v41_v5 }
  0xa6   :  { %v39_v7 = vpop.xlane.xlu0 %38 }
  0xa7   :  { %v42_v8 = vmul.f32 0.03125, %v39_v7  ;;  %v45_v9 = vmul.f32 %v43_v6, %v43_v6 }
  0xa9   :  { %v44_v10 = vsub.f32 %v30_v1, %v42_v8  ;;  %v47_v11 = vsel %vm33_vm0, %v45_v9, 0.0 }
  0xaa   :  { %48 = vadd.xlane.f32.xlu1 %v47_v11 }
  0xab   :  { %v46_v12 = vmul.f32 %v44_v10, %v44_v10 }
  0xad   :  { %v50_v13 = vsel %vm33_vm0, %v46_v12, 0.0 }
  0xae   :  { %51 = vadd.xlane.f32.xlu1 %v50_v13 }
 0x137   :  { %v49_v14 = vpop.xlane.xlu1 %48 }
 0x138   :  { %v53_v15 = vmul.f32 0.03125, %v49_v14 }
 0x13a   :  { %v55_v16 = vadd.f32 1e-12, %v53_v15 }
 0x13b   :  { %v52_v17 = vpop.xlane.xlu1 %51 }
 0x13c   :  { %117 = vrsqrt.f32 %v55_v16  ;;  %v54_v18 = vmul.f32 0.03125, %v52_v17 }
 0x13e   :  { %v56_v19 = vadd.f32 1e-12, %v54_v18 }
 0x140   :  { %119 = vrsqrt.f32 %v56_v19 }
 0x146   :  { %v118_v20 = vpop.eup %117 }
 0x147   :  { %v59_v22 = vmul.f32 %v118_v20, %v43_v6 }
 0x149   :  { %v67_v24 = vmul.f32 %v105_v21, %v59_v22 }
 0x14a   :  { %v120_v25 = vpop.eup %119 }
 0x14b   :  { %v60_v26 = vmul.f32 %v120_v25, %v44_v10  ;;  %v75_v27 = vadd.f32 %v106_v23, %v67_v24 }
 0x14d   :  { %v68_v28 = vmul.f32 %v105_v21, %v60_v26  ;;  %v109_v29 = vpack.c.bf16 %v75_v27, %v75_v27 }
 0x14f   :  { %v76_v30 = vadd.f32 %v106_v23, %v68_v28  ;;  %86 = vst.msk [vmem:[#allocation5] sm:$0xf] %vm85_vm1, %v109_v29 }
 0x151   :  { %v110_v31 = vpack.c.bf16 %v76_v30, %v76_v30 }
 0x153   :  { %87 = vst.msk [vmem:[#allocation5 + $0x4] sm:$0xf] %vm85_vm1, %v110_v31 }
 0x154   :  { %154 = shalt.err (!%p151_p12)
}
 0x155   :  { %s155_s5 = scalar_lea.hbm %s232_s3, 128 }
 0x156   :  { %p156_p13 = scmp.ne.s32.totalorder %s232_s3, %s155_s5  ;;  %p159_p0 = scmp.lt.u32.totalorder %s155_s5, %s232_s3 }
 0x158   :  { %p161_p1 = pnand %p159_p0, %p156_p13 }
 0x15a   :  { %164 = shalt.err (!%p161_p1)
}
 0x15b   :  { %s173_s10 = smov 64   ;;  %s174_s11 = smov 4  }
 0x15c   :  { %99 = dma.vmem_to_hbm [thread:$0]  %s94_s30, 128, %s232_s3, [#allocation4], %s173_s10, %s173_s10, %s174_s11  }
 0x15d   :  { %167 = dma.done.wait [#allocation4], 128  }
 0x15e   :  { %168 = vsyncadd [#allocation4], 4294967168 }
 0x15f   :  { %103 = vsyncpa [#allocation3], 1 }
 0x160   :  { %104 = vsyncpa [#allocation4], 1 }

</bundles_post_ra>
